<compile_context>
chip_gen: v6e
topology: v6e:2x2x1
jax: 0.10.0
libtpu: 0.0.40
codegen_flags: <defaults>
</compile_context>

<pallas_src>
import functools
import math

import jax
import jax.numpy as jnp
import numpy as np
from jax.experimental import pallas as pl
from jax.experimental.pallas import tpu as pltpu

INV_SQRT_PI = 1.0 / math.sqrt(math.pi)


def _gauss_scorer_kernel(sup_ref, tst_ref, w1_ref, b1_ref, w2_ref, b2_ref,
                         out_ref, *, c: float):
    # sup_ref: (Bb, S, F) support features;  tst_ref: (Bb, F) test features.
    Bb, S, F = sup_ref.shape
    D = w1_ref.shape[1]

    def mlp(x2d):  # (M, F) -> (M, D), 2-layer ReLU MLP on the MXU
        h = jnp.dot(x2d, w1_ref[...],
                    preferred_element_type=jnp.float32) + b1_ref[...]
        h = jnp.maximum(h, 0.0)
        h = jnp.dot(h, w2_ref[...],
                    preferred_element_type=jnp.float32) + b2_ref[...]
        return jnp.maximum(h, 0.0)

    # Support path: one fused matmul over all Bb*S rows.
    # (Demo uses S % 8 == 0 so the 3D<->2D reshapes are sublane-free views.)
    hs = mlp(sup_ref[...].reshape(Bb * S, F)).reshape(Bb, S, D)   # (Bb,S,D)
    # Test path: tiny matmul over Bb rows, then broadcast into the batch dim.
    ht = mlp(tst_ref[...])[:, None, :]                            # (Bb,1,D)

    # feature_norm: per-batch min/max clamped with the test feature.
    s_max = jnp.maximum(jnp.max(hs, axis=1, keepdims=True), ht)   # (Bb,1,D)
    s_min = jnp.minimum(jnp.min(hs, axis=1, keepdims=True), ht)   # (Bb,1,D)
    scale = s_max - s_min
    scale = scale + (scale == 0.0).astype(jnp.float32)
    inv_scale = pl.reciprocal(scale)          # exact: keeps 1e-4/1e-5 tolerance

    # (t_norm - s_norm) == (ht - hs) * inv_scale; the 1/bw factor is fused
    # into the compile-time scalar c = -0.5/bw^2 applied to the sq. distance.
    diff = (ht - hs) * inv_scale                      # (Bb, S, D)
    sq = jnp.sum(diff * diff, axis=-1)                # (Bb, S) lane-dense
    k = INV_SQRT_PI * jnp.exp(sq * c)                 # (Bb, S)
    k_sum = jnp.sum(k, axis=-1, keepdims=True)        # (Bb, 1)
    out_ref[...] = k * pl.reciprocal(k_sum)           # (Bb, S)


def _pick_batch_block(B, S, F, target_bytes=1 << 20):
    """Batch items per grid step.

    Picks Bb so that (a) B % Bb == 0, (b) Bb % 8 == 0 (sublane constraint on
    the (Bb, S) output / (Bb, F) test blocks), (c) there are >= 2 grid steps
    when possible (DMA/compute overlap + v7x megacore on the 'parallel' axis),
    and (d) the per-step support block stays around `target_bytes` so the
    ~0.35 us/step pipeline overhead is negligible while the per-step VMEM
    footprint stays small (fits v7x's 64 MiB / v5e's tighter scoped default).
    """
    if B <= 8 or B % 8 != 0:
        return B                      # single step; Bb == B is always legal
    per_item = max(S * F * 4, 1)
    cands = [d for d in range(8, B, 8) if B % d == 0]
    if not cands:
        return B
    under = [d for d in cands if d * per_item <= target_bytes]
    return max(under) if under else min(cands)


def gaussian_kernel_similarity_scorer(support_feat, test_feat,
                                      support_target, test_target,
                                      w1, b1, w2, b2, bandwidth,
                                      *, batch_block=None):
    """Matches GaussianKernelSimilarityScorer.forward.

    support_feat: (B, S, F) f32
    test_feat:    (B, F)    f32
    targets accepted for signature parity but unused (as in the module).
    bandwidth is treated as a static Python scalar (non-learnable in the
    module) and baked into the kernel.
    Returns k_weights: (B, S) f32.
    """
    del support_target, test_target                   # unused by the forward
    B, S, F = support_feat.shape
    D = w1.shape[1]

    Bb = _pick_batch_block(B, S, F) if batch_block is None else batch_block
    assert B % Bb == 0, "batch_block must divide B"
    assert Bb % 8 == 0 or Bb == B, (
        "batch_block must be a multiple of 8 (sublane constraint on the "
        "(Bb, S) output and (Bb, F) test blocks) or equal to B")
    nb = B // Bb

    # Bake the bandwidth into the exp scale: exp(-0.5*||d/bw||^2) = exp(c*||d||^2)
    c = float(-0.5 / (float(bandwidth) ** 2))
    kernel = functools.partial(_gauss_scorer_kernel, c=c)

    # Per-step VMEM footprint estimate: double-buffered input/output blocks,
    # resident weights, plus headroom for hs/diff temporaries.  Cap at 48 MiB
    # (under v7x's 64 MiB physical), floor at 32 MiB (raises v5e's 16 MiB
    # default scoped limit; matches the v6e/v7x default).
    vmem_need = (2 * Bb * S * F * 4          # support blocks (double-buffered)
                 + 2 * Bb * F * 4            # test blocks
                 + 2 * Bb * S * 4            # output blocks
                 + (F * D + D * D + 2 * D) * 4   # resident weights/biases
                 + 4 * Bb * S * D * 4)       # hs / diff temporaries headroom
    vmem_limit = int(min(48 << 20, max(32 << 20, 2 * vmem_need)))

    return pl.pallas_call(
        kernel,
        out_shape=jax.ShapeDtypeStruct((B, S), jnp.float32),
        grid=(nb,),
        in_specs=[
            # support features, blocked over the batch axis only
            pl.BlockSpec((Bb, S, F), lambda g: (g, 0, 0)),
            # test features, blocked over the batch axis only
            pl.BlockSpec((Bb, F), lambda g: (g, 0)),
            # MLP weights/biases: unblocked, grid-invariant VMEM residents
            pl.BlockSpec(memory_space=pltpu.MemorySpace.VMEM),   # W1 (F, D)
            pl.BlockSpec(memory_space=pltpu.MemorySpace.VMEM),   # b1 (1, D)
            pl.BlockSpec(memory_space=pltpu.MemorySpace.VMEM),   # W2 (D, D)
            pl.BlockSpec(memory_space=pltpu.MemorySpace.VMEM),   # b2 (1, D)
        ],
        out_specs=pl.BlockSpec((Bb, S), lambda g: (g, 0)),       # lane-dense
        compiler_params=pltpu.CompilerParams(
            dimension_semantics=("parallel",),
            vmem_limit_bytes=vmem_limit),
    )(support_feat, test_feat, w1, b1, w2, b2)


def _reference(support_feat, test_feat, w1, b1, w2, b2, bandwidth):
    """Pure-JAX reference mirroring the PyTorch module."""
    def feature_map(x):
        h = jnp.maximum(x @ w1 + b1[0], 0.0)
        h = jnp.maximum(h @ w2 + b2[0], 0.0)
        return h

    s = feature_map(support_feat)                     # (B, S, D)
    t = feature_map(test_feat)                        # (B, D)
    s_max = jnp.maximum(jnp.max(s, axis=-2), t)       # (B, D)
    s_min = jnp.minimum(jnp.min(s, axis=-2), t)       # (B, D)
    scale = s_max - s_min
    scale = scale + (scale == 0.0).astype(jnp.float32)
    s_n = (s - s_min[:, None, :]) / scale[:, None, :]
    t_n = (t - s_min) / scale
    diff = (t_n[:, None, :] - s_n) / bandwidth
    k = INV_SQRT_PI * jnp.exp(-0.5 * jnp.sum(diff * diff, axis=-1))  # (B, S)
    return k / jnp.sum(k, axis=-1, keepdims=True)


if __name__ == "__main__":
    # Small shapes; B=16 exercises the multi-step grid (Bb=8, nb=2).
    B, S, F, D = 16, 8, 32, 32
    bandwidth = 0.5

    key = jax.random.PRNGKey(0)
    k_sup, k_tst, k_w1, k_b1, k_w2, k_b2, k_st, k_tt = jax.random.split(key, 8)

    support_feat = jax.random.normal(k_sup, (B, S, F), jnp.float32)
    test_feat = jax.random.normal(k_tst, (B, F), jnp.float32)
    support_target = jax.random.randint(k_st, (B, S), 0, 5)
    test_target = jax.random.randint(k_tt, (B, 1), 0, 5)

    # Deterministic parameter init (Xavier-normal weights, uniform biases),
    # matching the module's parameter shapes; weights stored as (in, out).
    std1 = math.sqrt(2.0 / (F + D))
    std2 = math.sqrt(2.0 / (D + D))
    w1 = jax.random.normal(k_w1, (F, D), jnp.float32) * std1
    w2 = jax.random.normal(k_w2, (D, D), jnp.float32) * std2
    b1 = jax.random.uniform(k_b1, (1, D), jnp.float32,
                            -1.0 / math.sqrt(F), 1.0 / math.sqrt(F))
    b2 = jax.random.uniform(k_b2, (1, D), jnp.float32,
                            -1.0 / math.sqrt(D), 1.0 / math.sqrt(D))

    out = gaussian_kernel_similarity_scorer(
        support_feat, test_feat, support_target, test_target,
        w1, b1, w2, b2, bandwidth)
    out = jax.block_until_ready(out)

    ref = _reference(support_feat, test_feat, w1, b1, w2, b2, bandwidth)
    np.testing.assert_allclose(np.asarray(out), np.asarray(ref),
                               rtol=1e-4, atol=1e-5)
    assert out.shape == (B, S)
    print("KERNEL_OK")
</pallas_src>

<mosaic_0001>
module attributes {stable_mosaic.version = 11 : i64} {
  func.func @_gauss_scorer_kernel(%arg0: i32, %arg1: memref<8x8x32xf32, #tpu.memory_space<vmem>>, %arg2: memref<8x32xf32, #tpu.memory_space<vmem>>, %arg3: memref<32x32xf32, #tpu.memory_space<vmem>>, %arg4: memref<1x32xf32, #tpu.memory_space<vmem>>, %arg5: memref<32x32xf32, #tpu.memory_space<vmem>>, %arg6: memref<1x32xf32, #tpu.memory_space<vmem>>, %arg7: memref<8x8xf32, #tpu.memory_space<vmem>>) attributes {dimension_semantics = [#tpu.dimension_semantics<parallel>], iteration_bounds = array<i64: 2>, scalar_prefetch = 0 : i64, scratch_operands = 0 : i64, tpu.core_type = #tpu.core_type<tc>, window_params = [{transform_indices = @transform_0, window_bounds = array<i64: 8, 8, 32>}, {transform_indices = @transform_1, window_bounds = array<i64: 8, 32>}, {pipeline_mode = #tpu.pipeline_mode<synchronous>, transform_indices = @transform_2, window_bounds = array<i64: 32, 32>}, {pipeline_mode = #tpu.pipeline_mode<synchronous>, transform_indices = @transform_3, window_bounds = array<i64: 1, 32>}, {pipeline_mode = #tpu.pipeline_mode<synchronous>, transform_indices = @transform_4, window_bounds = array<i64: 32, 32>}, {pipeline_mode = #tpu.pipeline_mode<synchronous>, transform_indices = @transform_5, window_bounds = array<i64: 1, 32>}, {transform_indices = @transform_6, window_bounds = array<i64: 8, 8>}]} {
    %c0 = arith.constant 0 : index
    %c0_0 = arith.constant 0 : index
    %c0_1 = arith.constant 0 : index
    %0 = vector.load %arg1[%c0, %c0_0, %c0_1] : memref<8x8x32xf32, #tpu.memory_space<vmem>>, vector<8x8x32xf32>
    %1 = vector.shape_cast %0 : vector<8x8x32xf32> to vector<64x32xf32>
    %c0_2 = arith.constant 0 : index
    %c0_3 = arith.constant 0 : index
    %2 = vector.load %arg3[%c0_2, %c0_3] : memref<32x32xf32, #tpu.memory_space<vmem>>, vector<32x32xf32>
    %cst = arith.constant dense<0.000000e+00> : vector<64x32xf32>
    %3 = tpu.matmul %1, %2, %cst {dimension_numbers = #tpu.dot_dimension_numbers<[1], [0], [0], [1], [0, 0, 1, 1], [], []>} : vector<64x32xf32>, vector<32x32xf32>, vector<64x32xf32> -> vector<64x32xf32>
    %c0_4 = arith.constant 0 : index
    %c0_5 = arith.constant 0 : index
    %4 = vector.load %arg4[%c0_4, %c0_5] : memref<1x32xf32, #tpu.memory_space<vmem>>, vector<1x32xf32>
    %5 = vector.broadcast %4 : vector<1x32xf32> to vector<64x32xf32>
    %6 = arith.addf %3, %5 : vector<64x32xf32>
    %cst_6 = arith.constant 0.000000e+00 : f32
    %7 = vector.broadcast %cst_6 : f32 to vector<64x32xf32>
    %8 = arith.maximumf %6, %7 : vector<64x32xf32>
    %c0_7 = arith.constant 0 : index
    %c0_8 = arith.constant 0 : index
    %9 = vector.load %arg5[%c0_7, %c0_8] : memref<32x32xf32, #tpu.memory_space<vmem>>, vector<32x32xf32>
    %cst_9 = arith.constant dense<0.000000e+00> : vector<64x32xf32>
    %10 = tpu.matmul %8, %9, %cst_9 {dimension_numbers = #tpu.dot_dimension_numbers<[1], [0], [0], [1], [0, 0, 1, 1], [], []>} : vector<64x32xf32>, vector<32x32xf32>, vector<64x32xf32> -> vector<64x32xf32>
    %c0_10 = arith.constant 0 : index
    %c0_11 = arith.constant 0 : index
    %11 = vector.load %arg6[%c0_10, %c0_11] : memref<1x32xf32, #tpu.memory_space<vmem>>, vector<1x32xf32>
    %12 = vector.broadcast %11 : vector<1x32xf32> to vector<64x32xf32>
    %13 = arith.addf %10, %12 : vector<64x32xf32>
    %cst_12 = arith.constant 0.000000e+00 : f32
    %14 = vector.broadcast %cst_12 : f32 to vector<64x32xf32>
    %15 = arith.maximumf %13, %14 : vector<64x32xf32>
    %16 = vector.shape_cast %15 : vector<64x32xf32> to vector<8x8x32xf32>
    %c0_13 = arith.constant 0 : index
    %c0_14 = arith.constant 0 : index
    %17 = vector.load %arg2[%c0_13, %c0_14] : memref<8x32xf32, #tpu.memory_space<vmem>>, vector<8x32xf32>
    %c0_15 = arith.constant 0 : index
    %c0_16 = arith.constant 0 : index
    %18 = vector.load %arg3[%c0_15, %c0_16] : memref<32x32xf32, #tpu.memory_space<vmem>>, vector<32x32xf32>
    %cst_17 = arith.constant dense<0.000000e+00> : vector<8x32xf32>
    %19 = tpu.matmul %17, %18, %cst_17 {dimension_numbers = #tpu.dot_dimension_numbers<[1], [0], [0], [1], [0, 0, 1, 1], [], []>} : vector<8x32xf32>, vector<32x32xf32>, vector<8x32xf32> -> vector<8x32xf32>
    %c0_18 = arith.constant 0 : index
    %c0_19 = arith.constant 0 : index
    %20 = vector.load %arg4[%c0_18, %c0_19] : memref<1x32xf32, #tpu.memory_space<vmem>>, vector<1x32xf32>
    %21 = vector.broadcast %20 : vector<1x32xf32> to vector<8x32xf32>
    %22 = arith.addf %19, %21 : vector<8x32xf32>
    %cst_20 = arith.constant 0.000000e+00 : f32
    %23 = vector.broadcast %cst_20 : f32 to vector<8x32xf32>
    %24 = arith.maximumf %22, %23 : vector<8x32xf32>
    %c0_21 = arith.constant 0 : index
    %c0_22 = arith.constant 0 : index
    %25 = vector.load %arg5[%c0_21, %c0_22] : memref<32x32xf32, #tpu.memory_space<vmem>>, vector<32x32xf32>
    %cst_23 = arith.constant dense<0.000000e+00> : vector<8x32xf32>
    %26 = tpu.matmul %24, %25, %cst_23 {dimension_numbers = #tpu.dot_dimension_numbers<[1], [0], [0], [1], [0, 0, 1, 1], [], []>} : vector<8x32xf32>, vector<32x32xf32>, vector<8x32xf32> -> vector<8x32xf32>
    %c0_24 = arith.constant 0 : index
    %c0_25 = arith.constant 0 : index
    %27 = vector.load %arg6[%c0_24, %c0_25] : memref<1x32xf32, #tpu.memory_space<vmem>>, vector<1x32xf32>
    %28 = vector.broadcast %27 : vector<1x32xf32> to vector<8x32xf32>
    %29 = arith.addf %26, %28 : vector<8x32xf32>
    %cst_26 = arith.constant 0.000000e+00 : f32
    %30 = vector.broadcast %cst_26 : f32 to vector<8x32xf32>
    %31 = arith.maximumf %29, %30 : vector<8x32xf32>
    %32 = vector.shape_cast %31 : vector<8x32xf32> to vector<8x1x32xf32>
    %cst_27 = arith.constant dense<0xFF800000> : vector<8x32xf32>
    %33 = vector.multi_reduction <maximumf>, %16, %cst_27 [1] : vector<8x8x32xf32> to vector<8x32xf32>
    %34 = vector.shape_cast %33 : vector<8x32xf32> to vector<8x1x32xf32>
    %35 = arith.maximumf %34, %32 : vector<8x1x32xf32>
    %cst_28 = arith.constant dense<0x7F800000> : vector<8x32xf32>
    %36 = vector.multi_reduction <minimumf>, %16, %cst_28 [1] : vector<8x8x32xf32> to vector<8x32xf32>
    %37 = vector.shape_cast %36 : vector<8x32xf32> to vector<8x1x32xf32>
    %38 = arith.minimumf %37, %32 : vector<8x1x32xf32>
    %39 = arith.subf %35, %38 : vector<8x1x32xf32>
    %cst_29 = arith.constant 0.000000e+00 : f32
    %40 = vector.broadcast %cst_29 : f32 to vector<8x1x32xf32>
    %41 = arith.cmpf oeq, %39, %40 : vector<8x1x32xf32>
    %42 = arith.extui %41 : vector<8x1x32xi1> to vector<8x1x32xi32>
    %43 = arith.sitofp %42 : vector<8x1x32xi32> to vector<8x1x32xf32>
    %44 = arith.addf %39, %43 : vector<8x1x32xf32>
    %45 = tpu.reciprocal %44 : vector<8x1x32xf32> -> vector<8x1x32xf32>
    %46 = vector.broadcast %32 : vector<8x1x32xf32> to vector<8x8x32xf32>
    %47 = arith.subf %46, %16 : vector<8x8x32xf32>
    %48 = vector.broadcast %45 : vector<8x1x32xf32> to vector<8x8x32xf32>
    %49 = arith.mulf %47, %48 : vector<8x8x32xf32>
    %50 = arith.mulf %49, %49 : vector<8x8x32xf32>
    %cst_30 = arith.constant dense<0.000000e+00> : vector<8x8xf32>
    %51 = vector.multi_reduction <add>, %50, %cst_30 [2] : vector<8x8x32xf32> to vector<8x8xf32>
    %cst_31 = arith.constant -2.000000e+00 : f32
    %52 = vector.broadcast %cst_31 : f32 to vector<8x8xf32>
    %53 = arith.mulf %51, %52 : vector<8x8xf32>
    %54 = math.exp %53 : vector<8x8xf32>
    %cst_32 = arith.constant 0.564189613 : f32
    %55 = vector.broadcast %cst_32 : f32 to vector<8x8xf32>
    %56 = arith.mulf %55, %54 : vector<8x8xf32>
    %cst_33 = arith.constant dense<0.000000e+00> : vector<8xf32>
    %57 = vector.multi_reduction <add>, %56, %cst_33 [1] : vector<8x8xf32> to vector<8xf32>
    %58 = vector.shape_cast %57 : vector<8xf32> to vector<8x1xf32>
    %59 = tpu.reciprocal %58 : vector<8x1xf32> -> vector<8x1xf32>
    %60 = vector.broadcast %59 : vector<8x1xf32> to vector<8x8xf32>
    %61 = arith.mulf %56, %60 : vector<8x8xf32>
    %c0_34 = arith.constant 0 : index
    %c0_35 = arith.constant 0 : index
    %62 = vector.load %arg7[%c0_34, %c0_35] : memref<8x8xf32, #tpu.memory_space<vmem>>, vector<8x8xf32>
    tpu.vector_store %arg7[%c0_34, %c0_35], %61 {strides = array<i32>} : memref<8x8xf32, #tpu.memory_space<vmem>>, vector<8x8xf32>,
    return
  }
  func.func @transform_0(%arg0: i32) -> (i32, i32, i32) {
    %c0_i32 = arith.constant 0 : i32
    %c0_i32_0 = arith.constant 0 : i32
    %c0_i32_1 = arith.constant 0 : i32
    return %arg0, %c0_i32, %c0_i32_0 : i32, i32, i32
  }
  func.func @transform_1(%arg0: i32) -> (i32, i32) {
    %c0_i32 = arith.constant 0 : i32
    %c0_i32_0 = arith.constant 0 : i32
    return %arg0, %c0_i32 : i32, i32
  }
  func.func @transform_2(%arg0: i32) -> (i32, i32) {
    %c0_i32 = arith.constant 0 : i32
    %c0_i32_0 = arith.constant 0 : i32
    %c0_i32_1 = arith.constant 0 : i32
    return %c0_i32, %c0_i32_0 : i32, i32
  }
  func.func @transform_3(%arg0: i32) -> (i32, i32) {
    %c0_i32 = arith.constant 0 : i32
    %c0_i32_0 = arith.constant 0 : i32
    %c0_i32_1 = arith.constant 0 : i32
    return %c0_i32, %c0_i32_0 : i32, i32
  }
  func.func @transform_4(%arg0: i32) -> (i32, i32) {
    %c0_i32 = arith.constant 0 : i32
    %c0_i32_0 = arith.constant 0 : i32
    %c0_i32_1 = arith.constant 0 : i32
    return %c0_i32, %c0_i32_0 : i32, i32
  }
  func.func @transform_5(%arg0: i32) -> (i32, i32) {
    %c0_i32 = arith.constant 0 : i32
    %c0_i32_0 = arith.constant 0 : i32
    %c0_i32_1 = arith.constant 0 : i32
    return %c0_i32, %c0_i32_0 : i32, i32
  }
  func.func @transform_6(%arg0: i32) -> (i32, i32) {
    %c0_i32 = arith.constant 0 : i32
    %c0_i32_0 = arith.constant 0 : i32
    return %arg0, %c0_i32 : i32, i32
  }
}

</mosaic_0001>

<bundles_post_ra>
// kernel: tpu_custom_call.1
= control target key start
LH: loop header
LB: loop body
LE: loop exit
PB: predicated region body
PF: predicated region fallthrough
CT: control target
= control target key end

     0   :  { %s2379_s0 = inlined_call_operand.hbm [shape: f32[16,8,32], index: 0, kind: input, shape index: {}]   ;;  %s2380_s1 = inlined_call_operand.hbm [shape: f32[16,32], index: 1, kind: input, shape index: {}]   ;;  %s2381_s2 = inlined_call_operand.hbm [shape: f32[32,32], index: 2, kind: input, shape index: {}]   ;;  %s2382_s3 = inlined_call_operand.vmem [shape: f32[1,32], index: 3, kind: input, shape index: {}]   ;;  %s2383_s4 = inlined_call_operand.hbm [shape: f32[32,32], index: 4, kind: input, shape index: {}]   ;;  %s2384_s5 = inlined_call_operand.vmem [shape: f32[1,32], index: 5, kind: input, shape index: {}]   ;;  %s2385_s6 = inlined_call_operand.vmem [shape: f32[16,8], index: 6, kind: output, shape index: {}]  }
   0x1   :  { %2389 = sst [smem:[#allocation13_spill]] %s2379_s0 }
   0x2   :  { %11 = vsyncpa [#allocation3], 0 }
   0x3   :  { %13 = vsyncpa [#allocation3 + $0x1], 0 }
   0x4   :  { %14 = vsyncpa [#allocation5], 0 }
   0x5   :  { %16 = vsyncpa [#allocation5 + $0x1], 0 }
   0x6   :  { %17 = vsyncpa [#allocation8], 0  ;;  %s1919_s21 = smov 0   ;;  %s1921_s22 = smov 0  }
   0x7   :  { %s1923_s23 = smov 0   ;;  %s1925_s24 = smov 0  }
   0x8 LB: > { %s1938_s25 = sadd.s32 4294967295, %s1872_s24   ;;  %p43_p0 = scmp.ne.s32.totalorder %s1864_s22, %s1860_s21  ;;  %s1872_s24 = sphi %s1925_s24, %s2405_s24   ;;  %s1868_s23 = sphi %s1923_s23, %s2404_s23   ;;  %s1864_s22 = sphi %s1921_s22, %s2403_s22   ;;  %s1860_s21 = sphi %s1919_s21, %s2402_s21  }
   0x9   : > { %p2386_p1 = scmp.eq.s32.totalorder %s1938_s25, 0  ;;  %p1469_p2 = scmp.ge.s32.totalorder %s1872_s24, 1 }
   0xa   : > { %p190_p3 = scmp.lt.s32.totalorder %s1872_s24, 3  ;;  %s1874_s28 = smov [#allocation6]  }
   0xb   : > { %p1946_p4 = por %p2386_p1, %p43_p0  ;;  %s202_s29 = sshll.u32 %s1874_s28, 4  ;;  %s203_s29 = int_to_ptr.vmem [resolvable:$true] %s202_s29 }
   0xc   : > { %p1950_p5 = pnand %p1469_p2, %p190_p3  ;;  %s1875_s7 = smov [#allocation7]  }
   0xd   : > { %s2390_s26 = scalar_select %p1946_p4, 1, 0 }
   0xe   : > { %s2391_s27 = scalar_select %p1950_p5, 1, 0 }
   0xf   : > { %p1623_p6 = pneg %p1950_p5  ;;  %s218_s8 = sshll.u32 %s1875_s7, 4  ;;  %s219_s8 = int_to_ptr.vmem [resolvable:$true] %s218_s8 }
  0x10   : > { %s1729_s9 = scalar_lea.vmem %s203_s29, 512  ;;  %p1737_p12 = scmp.lt.s32.totalorder %s203_s29, %s203_s29 }
  0x11   : > { %p1958_p7 = pnand %p1623_p6, %p2386_p1  ;;  %p1730_p9 = scmp.ne.s32.totalorder %s203_s29, %s1729_s9 }
  0x12   : > { %p1738_p13 = scmp.lt.s32.totalorder %s1729_s9, %s1729_s9 }
  0x13   : > { %p1720_p8 = pneg %p1958_p7 }
  0x14   : > { %p1739_p0 = por %p1738_p13, %p1737_p12 }
  0x15   : > { %p1732_p10 = pnand %p1730_p9, %p1720_p8 }
  0x17   : > { %p1733_p11 = pneg %p1732_p10 }
  0x19   : > { %p1740_p2 = pnand %p1739_p0, %p1733_p11 }
  0x1b   : > { %1743 = shalt.err (!%p1740_p2)
}
  0x1c   : > { %s1876_s10 = smov 128   ;;  %s1877_s11 = smov 8  }
  0x1d   : > { %1626 = dma.hbm_to_vmem [thread:$0]  (!%p1958_p7), %s2381_s2, 512, %s203_s29, [#allocation5], %s1876_s10, %s1876_s10, %s1877_s11  }
  0x1e   : > { %s1755_s14 = scalar_lea.vmem %s219_s8, 512  ;;  %p1763_p10 = scmp.lt.s32.totalorder %s219_s8, %s219_s8 }
  0x1f   : > { %p1756_p3 = scmp.ne.s32.totalorder %s219_s8, %s1755_s14  ;;  %p1764_p11 = scmp.lt.s32.totalorder %s1755_s14, %s1755_s14 }
  0x21   : > { %p1758_p6 = pnand %p1756_p3, %p1720_p8  ;;  %p1765_p12 = por %p1764_p11, %p1763_p10 }
  0x23   : > { %p1759_p9 = pneg %p1758_p6 }
  0x25   : > { %p1766_p13 = pnand %p1765_p12, %p1759_p9 }
  0x27   : > { %1769 = shalt.err (!%p1766_p13)
}
  0x28   : > { %1629 = dma.hbm_to_vmem [thread:$0]  (!%p1958_p7), %s2383_s4, 512, %s219_s8, [#allocation8], %s1876_s10, %s1876_s10, %s1877_s11  }
  0x29   : > { %s1987_s17 = sadd.s32 1, %s1872_s24   ;;  %s30_s18 = sadd.s32 1, %s1868_s23 }
  0x2a   : > { %s27_s19 = ssub.s32 %s1872_s24, %s1987_s17  ;;  %p37_p8 = scmp.ne.s32.totalorder %s1868_s23, %s1864_s22 }
  0x2b   : > { %p28_p0 = scmp.eq.s32.totalorder %s27_s19, 0  ;;  %p38_p2 = scmp.eq.s32.totalorder %s1872_s24, 0 }
  0x2c   : > { %p1639_p3 = scmp.lt.s32.totalorder %s1872_s24, 2  ;;  %s1997_s20 = sand.u32 1, %s1868_s23  }
  0x2d   : > { %s2000_s21 = scalar_select %p28_p0, %s1868_s23, %s30_s18  }
  0x2e   : > { %p39_p6 = por %p38_p2, %p37_p8  ;;  %s1473_s28 = sshll.u32 %s1997_s20, 6 }
  0x2f   : > { %s1514_s29 = sshll.u32 %s1872_s24, 10  ;;  %s2393_s0 = sld [smem:[#allocation13_spill]] }
  0x30   : > { %s239_s9 = scalar_lea.vmem [#allocation2], %s1473_s28  ;;  %p2009_p7 = pnand %p1639_p3, %p39_p6 }
  0x31   : > { %s246_s12 = sshll.u32 %s239_s9, 4  ;;  %s256_s14 = sand.u32 1, %s1872_s24   ;;  %s2013_s12 = int_to_ptr.vmem [resolvable:$true] %s246_s12 }
  0x32   : > { %s236_s15 = scalar_lea.sflag [#allocation3], %s1997_s20  ;;  %p1772_p10 = pneg %p2009_p7 }
  0x35   : > { %s2007_s8 = scalar_lea.hbm %s2393_s0, %s1514_s29  ;;  %s1775_s28 = scalar_lea.hbm %s2393_s0, 2048 }
  0x36   : > { %s1770_s16 = scalar_lea.hbm %s2007_s8, 1024  ;;  %p1776_p13 = scmp.lt.s32.totalorder %s2007_s8, %s2393_s0 }
  0x37   : > { %p1771_p9 = scmp.ne.s32.totalorder %s2007_s8, %s1770_s16  ;;  %p1777_p8 = scmp.lt.s32.totalorder %s1775_s28, %s1770_s16 }
  0x39   : > { %p1773_p11 = pnand %p1772_p10, %p1771_p9  ;;  %p1778_p0 = por %p1777_p8, %p1776_p13 }
  0x3b   : > { %p1774_p12 = pneg %p1773_p11 }
  0x3d   : > { %p1779_p2 = pnand %p1778_p0, %p1774_p12 }
  0x3f   : > { %1782 = shalt.err (!%p1779_p2)
}
  0x40   : > { %s1783_s7 = scalar_lea.vmem %s2013_s12, 1024  ;;  %s1878_s9 = smov [#allocation2]  }
  0x41   : > { %p1784_p3 = scmp.ne.s32.totalorder %s2013_s12, %s1783_s7  ;;  %s1788_s18 = sshll.u32 %s1878_s9, 4  ;;  %s1789_s18 = int_to_ptr.vmem [resolvable:$false] %s1788_s18 }
  0x42   : > { %s1790_s19 = scalar_lea.vmem %s1789_s18, 2048  ;;  %p1791_p11 = scmp.lt.s32.totalorder %s2013_s12, %s1789_s18 }
  0x43   : > { %p1786_p6 = pnand %p1784_p3, %p1772_p10  ;;  %p1792_p1 = scmp.lt.s32.totalorder %s1790_s19, %s1783_s7 }
  0x45   : > { %p1787_p9 = pneg %p1786_p6  ;;  %p1793_p4 = por %p1792_p1, %p1791_p11 }
  0x47   : > { %p1794_p13 = pnand %p1793_p4, %p1787_p9 }
  0x49   : > { %1797 = shalt.err (!%p1794_p13)
}
  0x4a   : > { %1633 = dma.hbm_to_vmem [thread:$0]  (!%p2009_p7), %s2007_s8, 1024, %s2013_s12, %s236_s15, %s1876_s10, %s1876_s10, %s1877_s11  }
  0x4b   : > { %s1476_s16 = sshll.u32 %s1997_s20, 3  ;;  %s1477_s28 = sshll.u32 %s1872_s24, 7 }
  0x4c   : > { %s2051_s7 = scalar_lea.hbm %s2380_s1, %s1477_s28  ;;  %s260_s9 = scalar_lea.vmem [#allocation4], %s1476_s16 }
  0x4d   : > { %s267_s18 = sshll.u32 %s260_s9, 4  ;;  %s257_s19 = scalar_lea.sflag [#allocation5], %s256_s14  ;;  %s268_s18 = int_to_ptr.vmem [resolvable:$true] %s267_s18 }
  0x4e   : > { %s1798_s0 = scalar_lea.hbm %s2051_s7, 128  ;;  %s1803_s20 = scalar_lea.hbm %s2380_s1, 256 }
  0x4f   : > { %p1799_p1 = scmp.ne.s32.totalorder %s2051_s7, %s1798_s0  ;;  %p1804_p8 = scmp.lt.s32.totalorder %s2051_s7, %s2380_s1 }
  0x50   : > { %p1805_p0 = scmp.lt.s32.totalorder %s1803_s20, %s1798_s0 }
  0x51   : > { %p1801_p4 = pnand %p1799_p1, %p1772_p10 }
  0x52   : > { %p1806_p2 = por %p1805_p0, %p1804_p8 }
  0x53   : > { %p1802_p12 = pneg %p1801_p4 }
  0x55   : > { %p1807_p3 = pnand %p1806_p2, %p1802_p12 }
  0x57   : > { %1810 = shalt.err (!%p1807_p3)
}
  0x58   : > { %s1811_s24 = scalar_lea.vmem %s268_s18, 128  ;;  %s1879_s14 = smov [#allocation4]  }
  0x59   : > { %p1812_p6 = scmp.ne.s32.totalorder %s268_s18, %s1811_s24  ;;  %s1816_s15 = sshll.u32 %s1879_s14, 4  ;;  %s1817_s15 = int_to_ptr.vmem [resolvable:$false] %s1816_s15 }
  0x5a   : > { %s1818_s16 = scalar_lea.vmem %s1817_s15, 256  ;;  %p1819_p13 = scmp.lt.s32.totalorder %s268_s18, %s1817_s15 }
  0x5b   : > { %p1814_p9 = pnand %p1812_p6, %p1772_p10  ;;  %p1820_p1 = scmp.lt.s32.totalorder %s1818_s16, %s1811_s24 }
  0x5d   : > { %p1815_p11 = pneg %p1814_p9  ;;  %p1821_p4 = por %p1820_p1, %p1819_p13 }
  0x5f   : > { %p1822_p5 = pnand %p1821_p4, %p1815_p11 }
  0x61   : > { %1825 = shalt.err (!%p1822_p5)
}
  0x62   : > { %1636 = dma.hbm_to_vmem [thread:$0]  (!%p2009_p7), %s2051_s7, 128, %s268_s18, %s257_s19  }
  0x63   : > { %p2395_p12 = scmp.ne.s32.totalorder %s2391_s27, 0 }
  0x64   : > { %s278_s0 = sand.u32 (!%p2395_p12), 1, %s1864_s22   ;;  %p2396_p10 = scmp.ne.s32.totalorder (!%p2395_p12), %s2390_s26, 0 }
  0x65   : > { %276 = sbr.rel (%p2395_p12) target bundleno = 1072 (0x430), region = 44  ;;  %s1479_s28 = sshll.u32 (!%p2395_p12), %s278_s0, 6 }
  0x66   : > { %s279_s29 = scalar_lea.sflag (!%p2395_p12), [#allocation3], %s278_s0  ;;  %s2076_s30 = scalar_lea.vmem (!%p2395_p12), [#allocation2], %s1479_s28 }
  0x6a   : > { %1843 = dma.done.wait (%p2396_p10), %s279_s29, 1024  }
  0x6b   : > { %1845 = vsyncadd (%p2396_p10), %s279_s29, 4294966272  ;;  %s287_s13 = sand.u32 1, %s1938_s25   ;;  %s1480_s9 = sshll.u32 %s278_s0, 3 }
  0x6c   : > { %s288_s7 = scalar_lea.sflag [#allocation5], %s287_s13  ;;  %s2083_s18 = scalar_lea.vmem [#allocation4], %s1480_s9 }
  0x6d   : > { %1847 = dma.done.wait (%p2396_p10), %s288_s7, 128  }
  0x6e   : > { %1849 = vsyncadd (%p2396_p10), %s288_s7, 4294967168  ;;  %p2397_p5 = scmp.eq.s32.totalorder %s1938_s25, 0 }
  0x70   : > { %1851 = dma.done.wait (%p2397_p5), [#allocation5], 512   ;;  %p2398_p7 = pmov %p2397_p5 }
  0x71   : > { %p2399_p8 = pmov %p2397_p5 }
  0x72   : > { %1853 = vsyncadd (%p2398_p7), [#allocation5], 4294966784 }
  0x73   : > { %1855 = dma.done.wait (%p2399_p8), [#allocation8], 512   ;;  %p2400_p0 = pmov %p2397_p5 }
  0x74   : > { %vm356_vm0 = vcmask 261120   ;;  %v348_v0 = vld [vmem:[#allocation6 + $0x18] sm:$0xff]  ;;  %v347_v1 = vld [vmem:[#allocation6 + $0x10] sm:$0xff]  ;;  %v346_v3 = vld [vmem:[#allocation6 + $0x8] sm:$0xff]  ;;  %v1880_v8 = vmov 0.0   ;;  %vm1881_vm1 = vmmov 0  }
  0x75   : > { %1857 = vsyncadd (%p2400_p0), [#allocation8], 4294966784  ;;  %1549 = vmatprep.subr.mxu0 %v348_v0  ;;  %v337_v2 = vld [vmem:[%s2076_s30] sm:$0xff]  ;;  %v345_v4 = vld [vmem:[#allocation6] sm:$0xff]  ;;  %v1882_v61 = vmov 1966171168  }
  0x76   : > { %1550 = vmatpush3.msra.mxu0 %v348_v0  ;;  %1557 = vmatprep.mubr.msk.f32.mxu0 %vm356_vm0, %v337_v2  ;;  %v497_v5 = vld [vmem:[#allocation7 + $0x18] sm:$0xff]  ;;  %v339_v7 = vld [vmem:[%s2076_s30 + $0x10] sm:$0xff]  ;;  %v340_v9 = vld [vmem:[%s2076_s30 + $0x18] sm:$0xff]  ;;  %v794_v62 = vunpack.c.l.s4 %v1882_v61  ;;  %vm1219_vm10 = vcmask 1041409   ;;  %vm1221_vm11 = vcmask 1042434   ;;  %vm1223_vm12 = vcmask 1043459  }
  0x77   : > { %1551 = vmatprep.subr.mxu0 %v347_v1  ;;  %1569 = vmatprep.subr.mxu1 %v497_v5  ;;  %v338_v6 = vld [vmem:[%s2076_s30 + $0x8] sm:$0xff]  ;;  %v341_v10 = vld [vmem:[%s2076_s30 + $0x20] sm:$0xff]  ;;  %v343_v12 = vld [vmem:[%s2076_s30 + $0x30] sm:$0xff]  ;;  %vm1225_vm13 = vcmask 1044484   ;;  %vm1227_vm14 = vcmask 1045509   ;;  %vm1229_vm15 = vcmask 1046534  }
  0x78   : > { %1552 = vmatpush3.msra.mxu0 %v347_v1  ;;  %1570 = vmatpush3.msra.mxu1 %v497_v5  ;;  %v342_v11 = vld [vmem:[%s2076_s30 + $0x28] sm:$0xff]  ;;  %v344_v13 = vld [vmem:[%s2076_s30 + $0x38] sm:$0xff]  ;;  %v496_v15 = vld [vmem:[#allocation7 + $0x10] sm:$0xff]  ;;  %p333_p2 = scmp.lt.s32.totalorder %s1938_s25, 1 }
  0x79   : > { %1553 = vmatprep.subr.mxu0 %v346_v3  ;;  %v642_v14 = vld [vmem:[%s2083_s18] sm:$0xff]  ;;  %1571 = vmatprep.subr.mxu1 %v496_v15  ;;  %v495_v16 = vld [vmem:[#allocation7 + $0x8] sm:$0xff]  ;;  %v494_v17 = vld [vmem:[#allocation7] sm:$0xff] }
  0x7a   : > { %1554 = vmatpush3.msra.mxu0 %v346_v3  ;;  %1572 = vmatpush3.msra.mxu1 %v496_v15  ;;  %v1484_v18 = vld [vmem:[%s2382_s3] ss:$0 sm:$0xff]  ;;  %s2407_s25 = smov (!%p333_p2, %s1938_s25), 1 }
  0x7b   : > { %1555 = vmatprep.subr.mxu0 %v345_v4  ;;  %1573 = vmatprep.subr.mxu1 %v495_v16  ;;  %v2142_v47 = vld [vmem:[%s2384_s5] ss:$0 sm:$0xff]  ;;  %s1483_s11 = sshll.u32 %s2407_s25, 3 }
  0x7c   : > { %1556 = vmatpush3.msra.mxu0 %v345_v4  ;;  %1574 = vmatpush3.msra.mxu1 %v495_v16  ;;  %s336_s12 = scalar_lea.vmem %s2385_s6, %s1483_s11 }
  0x7d   : > { %1558 = vmatmul.mubr.msk.f32.vlgmr.msra.gmra.mxu0 %vm356_vm0, %v338_v6  ;;  %1589 = vmatprep.subr.mxu0 %v1880_v8 }
  0x7e   : > { %1560 = vmatprep.mubr.msk.f32.mxu0 %vm356_vm0, %v339_v7  ;;  %1590 = vmatpush3.msra.mxu0 %v348_v0 }
  0x7f   : > { %1591 = vmatprep.subr.mxu0 %v1880_v8  ;;  %1575 = vmatprep.subr.mxu1 %v494_v17 }
  0x80   : > { %1592 = vmatpush3.msra.mxu0 %v347_v1  ;;  %1576 = vmatpush3.msra.mxu1 %v494_v17 }
  0x81   : > { %1561 = vmatmul.mubr.msk.f32.gmra.mxu0 %vm356_vm0, %v340_v9  ;;  %1593 = vmatprep.subr.mxu0 %v1880_v8 }
  0x82   : > { %1563 = vmatprep.mubr.msk.f32.mxu0 %vm356_vm0, %v341_v10  ;;  %1594 = vmatpush3.msra.mxu0 %v346_v3 }
  0x83   : > { %1595 = vmatprep.subr.mxu0 %v1880_v8  ;;  %1600 = vmatprep.subr.mxu1 %v1880_v8 }
  0x84   : > { %1596 = vmatpush3.msra.mxu0 %v345_v4 }
  0x85   : > { %1564 = vmatmul.mubr.msk.f32.gmra.mxu0 %vm356_vm0, %v342_v11 }
  0x86   : > { %1566 = vmatprep.mubr.msk.f32.mxu0 %vm356_vm0, %v343_v12  ;;  %v796_v12 = vlaneseq }
  0x89   : > { %1567 = vmatmul.mubr.msk.f32.gmra.mxu0 %vm356_vm0, %v344_v13 }
  0x8a   : > { %1597 = vmatprep.mubr.msk.f32.mxu0 %vm1881_vm1, %v1880_v8 }
  0x8d   : > { %1598 = vmatmul.mubr.msk.f32.vlgmr.msra.gmra.mxu0 %vm356_vm0, %v642_v14 }
 0x13d   : > { %v1559_v19 = vpop.f32.mrf.mxu0 }
 0x13e   : > { %v453_v20 = vadd.f32 %v1559_v19, %v1484_v18 }
 0x13f   : > { %v447_v21 = vpop.f32.mrf.mxu0 }
 0x140   : > { %v448_v22 = vadd.f32 %v1484_v18, %v447_v21  ;;  %v487_v25 = vmax.f32 %v453_v20, 0.0 }
 0x141   : > { %v1562_v23 = vpop.f32.mrf.mxu0 }
 0x142   : > { %v486_v24 = vmax.f32 %v448_v22, 0.0  ;;  %v463_v26 = vadd.f32 %v1562_v23, %v1484_v18 }
 0x143   : > { %v457_v27 = vpop.f32.mrf.mxu0 }
 0x144   : > { %v458_v28 = vadd.f32 %v1484_v18, %v457_v27  ;;  %1577 = vmatprep.mubr.msk.f32.mxu1 %vm356_vm0, %v486_v24  ;;  %v489_v31 = vmax.f32 %v463_v26, 0.0 }
 0x145   : > { %v1565_v29 = vpop.f32.mrf.mxu0  ;;  %1578 = vmatmul.mubr.msk.f32.vlgmr.msra.gmra.mxu1 %vm356_vm0, %v487_v25 }
 0x146   : > { %v488_v30 = vmax.f32 %v458_v28, 0.0  ;;  %1601 = vmatpush3.msra.mxu1 %v497_v5  ;;  %v473_v32 = vadd.f32 %v1565_v29, %v1484_v18 }
 0x147   : > { %v467_v33 = vpop.f32.mrf.mxu0  ;;  %1602 = vmatprep.subr.mxu1 %v1880_v8 }
 0x148   : > { %v468_v34 = vadd.f32 %v1484_v18, %v467_v33  ;;  %1580 = vmatprep.mubr.msk.f32.mxu1 %vm356_vm0, %v488_v30  ;;  %1603 = vmatpush3.msra.mxu1 %v496_v15  ;;  %v491_v37 = vmax.f32 %v473_v32, 0.0  ;;  %v795_v32 = vunpack.c.0.s8 %v794_v62  ;;  %v2174_v33 = vshrl.u32 %v796_v12, 7 }
 0x149   : > { %v1568_v35 = vpop.f32.mrf.mxu0  ;;  %1581 = vmatmul.mubr.msk.f32.gmra.mxu1 %vm356_vm0, %v489_v31  ;;  %1604 = vmatprep.subr.mxu1 %v1880_v8 }
 0x14a   : > { %v490_v36 = vmax.f32 %v468_v34, 0.0  ;;  %1605 = vmatpush3.msra.mxu1 %v495_v16  ;;  %v483_v38 = vadd.f32 %v1568_v35, %v1484_v18 }
 0x14b   : > { %v477_v39 = vpop.f32.mrf.mxu0  ;;  %1606 = vmatprep.subr.mxu1 %v1880_v8 }
 0x14c   : > { %v478_v40 = vadd.f32 %v1484_v18, %v477_v39  ;;  %1583 = vmatprep.mubr.msk.f32.mxu1 %vm356_vm0, %v490_v36  ;;  %1607 = vmatpush3.msra.mxu1 %v494_v17  ;;  %v493_v44 = vmax.f32 %v483_v38, 0.0 }
 0x14d   : > { %1584 = vmatmul.mubr.msk.f32.gmra.mxu1 %vm356_vm0, %v491_v37  ;;  %v712_v41 = vpop.f32.mrf.mxu0 }
 0x14e   : > { %v492_v42 = vmax.f32 %v478_v40, 0.0  ;;  %v713_v43 = vadd.f32 %v1484_v18, %v712_v41 }
 0x14f   : > { %v1599_v45 = vpop.f32.mrf.mxu0 }
 0x150   : > { %1586 = vmatprep.mubr.msk.f32.mxu1 %vm356_vm0, %v492_v42  ;;  %v716_v46 = vmax.f32 %v713_v43, 0.0  ;;  %v2180_v45 = vsub.s32 %v795_v32, %v2174_v33 }
 0x151   : > { %1587 = vmatmul.mubr.msk.f32.gmra.mxu1 %vm356_vm0, %v493_v44 }
 0x152   : > { %1608 = vmatprep.mubr.msk.f32.mxu1 %vm1881_vm1, %v1880_v8  ;;  %vm1234_vm1 = vcmask 64512  }
 0x155   : > { %1609 = vmatmul.mubr.msk.f32.vlgmr.msra.gmra.mxu1 %vm356_vm0, %v716_v46 }
 0x205   : > { %v1579_v48 = vpop.f32.mrf.mxu1 }
 0x206   : > { %v601_v49 = vadd.f32 %v1579_v48, %v2142_v47 }
 0x207   : > { %v595_v50 = vpop.f32.mrf.mxu1 }
 0x208   : > { %v2145_v51 = vmax.f32 %v601_v49, 0.0  ;;  %v596_v52 = vadd.f32 %v2142_v47, %v595_v50 }
 0x209   : > { %v1582_v53 = vpop.f32.mrf.mxu1 }
 0x20a   : > { %v856_v54 = vsel %vm356_vm0, %v2145_v51, -inf  ;;  %v920_v55 = vsel %vm356_vm0, %v2145_v51, inf  ;;  %v2152_v56 = vmax.f32 %v596_v52, 0.0  ;;  %v611_v57 = vadd.f32 %v1582_v53, %v2142_v47 }
 0x20b   : > { %v857_v58 = vrot.slane %v856_v54, 4  ;;  %v921_v59 = vrot.slane %v920_v55, 4  ;;  %v605_v60 = vpop.f32.mrf.mxu1 }
 0x20c   : > { %v849_v63 = vsel %vm356_vm0, %v2152_v56, -inf  ;;  %v913_v0 = vsel %vm356_vm0, %v2152_v56, inf  ;;  %v2159_v1 = vmax.f32 %v611_v57, 0.0  ;;  %v606_v2 = vadd.f32 %v2142_v47, %v605_v60 }
 0x20d   : > { %v858_v3 = vmax.f32 %v856_v54, %v857_v58  ;;  %v922_v4 = vmin.f32 %v920_v55, %v921_v59  ;;  %v850_v5 = vrot.slane %v849_v63, 4  ;;  %v914_v6 = vrot.slane %v913_v0, 4  ;;  %v1585_v7 = vpop.f32.mrf.mxu1 }
 0x20e   : > { %v870_v9 = vsel %vm356_vm0, %v2159_v1, -inf  ;;  %v934_v10 = vsel %vm356_vm0, %v2159_v1, inf  ;;  %v2166_v11 = vmax.f32 %v606_v2, 0.0  ;;  %v621_v30 = vadd.f32 %v1585_v7, %v2142_v47 }
 0x20f   : > { %v859_v13 = vrot.slane %v858_v3, 2  ;;  %v923_v14 = vrot.slane %v922_v4, 2  ;;  %v851_v15 = vmax.f32 %v849_v63, %v850_v5  ;;  %v915_v16 = vmin.f32 %v913_v0, %v914_v6  ;;  %v615_v17 = vpop.f32.mrf.mxu1 }
 0x210   : > { %v871_v18 = vrot.slane %v870_v9, 4  ;;  %v935_v19 = vrot.slane %v934_v10, 4  ;;  %v863_v20 = vsel %vm356_vm0, %v2166_v11, -inf  ;;  %v927_v24 = vsel %vm356_vm0, %v2166_v11, inf }
 0x211   : > { %v860_v21 = vmax.f32 %v858_v3, %v859_v13  ;;  %v924_v22 = vmin.f32 %v922_v4, %v923_v14  ;;  %v852_v23 = vrot.slane %v851_v15, 2  ;;  %v1588_v25 = vpop.f32.mrf.mxu1  ;;  %v916_v26 = vrot.slane %v915_v16, 2 }
 0x212   : > { %v872_v27 = vmax.f32 %v870_v9, %v871_v18  ;;  %v936_v28 = vmin.f32 %v934_v10, %v935_v19  ;;  %v864_v29 = vrot.slane %v863_v20, 4  ;;  %v928_v37 = vrot.slane %v927_v24, 4 }
 0x213   : > { %v625_v31 = vpop.f32.mrf.mxu1  ;;  %v861_v34 = vrot.slane %v860_v21, 1  ;;  %v925_v35 = vrot.slane %v924_v22, 1  ;;  %v853_v36 = vmax.f32 %v851_v15, %v852_v23  ;;  %v917_v39 = vmin.f32 %v915_v16, %v916_v26 }
 0x214   : > { %v873_v40 = vrot.slane %v872_v27, 2  ;;  %v937_v41 = vrot.slane %v936_v28, 2  ;;  %v865_v42 = vmax.f32 %v863_v20, %v864_v29  ;;  %v2176_v43 = vmax.f32 %v621_v30, 0.0 }
 0x215   : > { %v786_v38 = vpop.f32.mrf.mxu1  ;;  %v616_v44 = vadd.f32 %v2142_v47, %v615_v17  ;;  %v2182_v48 = vmax.f32 %v860_v21, %v861_v34  ;;  %v2184_v49 = vmin.f32 %v924_v22, %v925_v35  ;;  %v854_v50 = vrot.slane %v853_v36, 1 }
 0x216   : > { %v929_v52 = vmin.f32 %v927_v24, %v928_v37  ;;  %v884_v53 = vsel %vm356_vm0, %v2176_v43, -inf  ;;  %v948_v54 = vsel %vm356_vm0, %v2176_v43, inf  ;;  %v631_v57 = vadd.f32 %v1588_v25, %v2142_v47 }
 0x217   : > { %v1610_v46 = vpop.f32.mrf.mxu1  ;;  %v2190_v55 = vmax.f32 %v616_v44, 0.0  ;;  %v918_v58 = vrot.slane %v917_v39, 1  ;;  %v874_v59 = vmax.f32 %v872_v27, %v873_v40  ;;  %v938_v60 = vmin.f32 %v936_v28, %v937_v41 }
 0x218   : > { %v866_v61 = vrot.slane %v865_v42, 2  ;;  %v885_v62 = vrot.slane %v884_v53, 4  ;;  %v949_v63 = vrot.slane %v948_v54, 4  ;;  %v2197_v3 = vmax.f32 %v853_v36, %v854_v50 }
 0x219   : > { %v877_v0 = vsel %vm356_vm0, %v2190_v55, -inf  ;;  %v941_v2 = vsel %vm356_vm0, %v2190_v55, inf  ;;  %v930_v4 = vrot.slane %v929_v52, 2  ;;  %v2199_v10 = vmax.f32 %v631_v57, 0.0 }
 0x21a   : > { %v878_v5 = vrot.slane %v877_v0, 4  ;;  %v942_v6 = vrot.slane %v941_v2, 4  ;;  %v886_v7 = vmax.f32 %v884_v53, %v885_v62  ;;  %v950_v9 = vmin.f32 %v948_v54, %v949_v63 }
 0x21b   : > { %v626_v13 = vadd.f32 %v2142_v47, %v625_v31  ;;  %v867_v14 = vmax.f32 %v865_v42, %v866_v61  ;;  %v787_v17 = vadd.f32 %v2142_v47, %v786_v38  ;;  %v898_v20 = vsel %vm356_vm0, %v2199_v10, -inf }
 0x21c   : > { %v879_v15 = vmax.f32 %v877_v0, %v878_v5  ;;  %v943_v16 = vmin.f32 %v941_v2, %v942_v6  ;;  %v887_v18 = vrot.slane %v886_v7, 2  ;;  %v951_v19 = vrot.slane %v950_v9, 2 }
 0x21d   : > { %v962_v21 = vsel %vm356_vm0, %v2199_v10, inf  ;;  %v899_v24 = vrot.slane %v898_v20, 4  ;;  %v875_v26 = vrot.slane %v874_v59, 1  ;;  %v931_v27 = vmin.f32 %v929_v52, %v930_v4 }
 0x21e   : > { %v880_v22 = vrot.slane %v879_v15, 2  ;;  %v944_v23 = vrot.slane %v943_v16, 2  ;;  %v963_v25 = vrot.slane %v962_v21, 4  ;;  %v888_v28 = vmax.f32 %v886_v7, %v887_v18 }
 0x21f   : > { %v2207_v29 = vmax.f32 %v626_v13, 0.0  ;;  %v900_v47 = vmax.f32 %v898_v20, %v899_v24  ;;  %v919_v34 = vmin.f32 %v917_v39, %v918_v58  ;;  %v790_v37 = vmax.f32 %v787_v17, 0.0 }
 0x220   : > { %v881_v30 = vmax.f32 %v879_v15, %v880_v22  ;;  %v945_v31 = vmin.f32 %v943_v16, %v944_v23  ;;  %v964_v32 = vmin.f32 %v962_v21, %v963_v25  ;;  %v939_v38 = vrot.slane %v938_v60, 1 }
 0x221   : > { %v891_v35 = vsel %vm356_vm0, %v2207_v29, -inf  ;;  %v955_v36 = vsel %vm356_vm0, %v2207_v29, inf  ;;  %v868_v40 = vrot.slane %v867_v14, 1  ;;  %v952_v41 = vmin.f32 %v950_v9, %v951_v19 }
 0x222   : > { %v882_v42 = vrot.slane %v881_v30, 1  ;;  %v2213_v44 = vmax.f32 %v874_v59, %v875_v26  ;;  %v932_v46 = vrot.slane %v931_v27, 1  ;;  %v892_v50 = vrot.slane %v891_v35, 4 }
 0x223   : > { %v956_v52 = vrot.slane %v955_v36, 4  ;;  %v889_v53 = vrot.slane %v888_v28, 1  ;;  %v946_v54 = vrot.slane %v945_v31, 1  ;;  %v901_v57 = vrot.slane %v900_v47, 2 }
 0x224   : > { %v965_v39 = vrot.slane %v964_v32, 2  ;;  %v893_v58 = vmax.f32 %v891_v35, %v892_v50  ;;  %v792_v62 = vcombine.high %v790_v37, %v790_v37  ;;  %v799_v63 = vrot.slane %v790_v37, %v2180_v45 }
 0x225   : > { %v957_v61 = vmin.f32 %v955_v36, %v956_v52  ;;  %v940_v0 = vmin.f32 %v938_v60, %v939_v38  ;;  %v869_v2 = vmax.f32 %v867_v14, %v868_v40  ;;  %v953_v4 = vrot.slane %v952_v41, 1 }
 0x226   : > { %v883_v5 = vmax.f32 %v881_v30, %v882_v42  ;;  %v894_v6 = vrot.slane %v893_v58, 2  ;;  %v806_v59 = vrot.slane %v792_v62, %v2180_v45  ;;  %v807_v9 = vcombine.high %v799_v63, %v799_v63 }
 0x227   : > { %v958_v7 = vrot.slane %v957_v61, 2  ;;  %v933_v13 = vmin.f32 %v931_v27, %v932_v46  ;;  %v890_v15 = vmax.f32 %v888_v28, %v889_v53  ;;  %v947_v16 = vmin.f32 %v945_v31, %v946_v54 }
 0x228   : > { %v2218_v17 = vrot.slane %v799_v63, %v2180_v45  ;;  %v902_v18 = vmax.f32 %v900_v47, %v901_v57  ;;  %v966_v19 = vmin.f32 %v964_v32, %v965_v39  ;;  %v808_v20 = vcombine.high %v806_v59, %v806_v59 }
 0x229   : > { %v2221_v21 = vrot.slane %v806_v59, %v2180_v45  ;;  %v895_v60 = vmax.f32 %v893_v58, %v894_v6  ;;  %v2224_v14 = vrot.slane %v807_v9, %v2180_v45  ;;  %v954_v24 = vmin.f32 %v952_v41, %v953_v4 }
 0x22a   : > { %v905_v22 = vmax.f32 %v2197_v3, %v2218_v17  ;;  %v969_v23 = vmin.f32 %v919_v34, %v2218_v17  ;;  %v959_v25 = vmin.f32 %v957_v61, %v958_v7  ;;  %v2230_v26 = vrot.slane %v808_v20, %v2180_v45 }
 0x22b   : > { %v909_v27 = vmax.f32 %v883_v5, %v2221_v21  ;;  %v906_v28 = vmax.f32 %v2182_v48, %v2224_v14  ;;  %v970_v30 = vmin.f32 %v2184_v49, %v2224_v14  ;;  %v973_v31 = vmin.f32 %v947_v16, %v2221_v21 }
 0x22c   : > { %v977_v47 = vsub.f32 %v905_v22, %v969_v23  ;;  %v903_v32 = vrot.slane %v902_v18, 1  ;;  %v967_v3 = vrot.slane %v966_v19, 1  ;;  %v910_v34 = vmax.f32 %v890_v15, %v2230_v26 }
 0x22d   : > { %v974_v35 = vmin.f32 %v954_v24, %v2230_v26  ;;  %v896_v36 = vrot.slane %v895_v60, 1  ;;  %v978_v45 = vsub.f32 %v906_v28, %v970_v30  ;;  %v981_v37 = vsub.f32 %v909_v27, %v973_v31 }
 0x22e   : > { %vm985_vm2 = vcmp.eq.f32.partialorder %v977_v47, 0.0  ;;  %v960_v38 = vrot.slane %v959_v25, 1  ;;  %v2243_v49 = vcombine.high %v2218_v17, %v2218_v17  ;;  %v2247_v42 = vcombine.high %v2224_v14, %v2224_v14 }
 0x22f   : > { %v982_v40 = vsub.f32 %v910_v34, %v974_v35  ;;  %v1504_v48 = vsel %vm985_vm2, 1.0, %v1880_v8  ;;  %vm986_vm3 = vcmp.eq.f32.partialorder %v978_v45, 0.0  ;;  %vm989_vm4 = vcmp.eq.f32.partialorder %v981_v37, 0.0 }
 0x230   : > { %v1009_v41 = vadd.f32 %v1504_v48, %v977_v47  ;;  %v1505_v46 = vsel %vm986_vm3, 1.0, %v1880_v8  ;;  %v1508_v50 = vsel %vm989_vm4, 1.0, %v1880_v8  ;;  %v907_v52 = vmax.f32 %v869_v2, %v2243_v49 }
 0x231   : > { %vm990_vm5 = vcmp.eq.f32.partialorder %v982_v40, 0.0  ;;  %v1010_v53 = vadd.f32 %v1505_v46, %v978_v45  ;;  %v1013_v54 = vadd.f32 %v1508_v50, %v981_v37  ;;  %v971_v57 = vmin.f32 %v933_v13, %v2243_v49 }
 0x232   : > { %1684 = vrcp.f32 %v1009_v41  ;;  %v908_v39 = vmax.f32 %v2213_v44, %v2247_v42  ;;  %v972_v58 = vmin.f32 %v940_v0, %v2247_v42  ;;  %v897_v61 = vmax.f32 %v895_v60, %v896_v36 }
 0x233   : > { %v979_v62 = vsub.f32 %v907_v52, %v971_v57  ;;  %1686 = vrcp.f32 %v1010_v53  ;;  %v961_v63 = vmin.f32 %v959_v25, %v960_v38  ;;  %v1509_v5 = vsel %vm990_vm5, 1.0, %v1880_v8 }
 0x234   : > { %v980_v4 = vsub.f32 %v908_v39, %v972_v58  ;;  %1688 = vrcp.f32 %v1013_v54  ;;  %v904_v2 = vmax.f32 %v902_v18, %v903_v32  ;;  %v968_v6 = vmin.f32 %v966_v19, %v967_v3 }
 0x235   : > { %vm987_vm6 = vcmp.eq.f32.partialorder %v979_v62, 0.0  ;;  %v1014_v7 = vadd.f32 %v1509_v5, %v982_v40  ;;  %v2261_v44 = vcombine.high %v2221_v21, %v2221_v21  ;;  %v2264_v0 = vsub.s32 0, %v2174_v33 }
 0x236   : > { %v1506_v59 = vsel %vm987_vm6, 1.0, %v1880_v8  ;;  %vm988_vm7 = vcmp.eq.f32.partialorder %v980_v4, 0.0  ;;  %v2269_v15 = vcombine.high %v2230_v26, %v2230_v26 }
 0x237   : > { %v1011_v9 = vadd.f32 %v1506_v59, %v979_v62  ;;  %v1507_v13 = vsel %vm988_vm7, 1.0, %v1880_v8  ;;  %1690 = vrcp.f32 %v1014_v7  ;;  %v911_v18 = vmax.f32 %v897_v61, %v2261_v44 }
 0x238   : > { %v1012_v16 = vadd.f32 %v1507_v13, %v980_v4  ;;  %v975_v19 = vmin.f32 %v961_v63, %v2261_v44  ;;  %v912_v20 = vmax.f32 %v904_v2, %v2269_v15  ;;  %v976_v60 = vmin.f32 %v968_v6, %v2269_v15 }
 0x239   : > { %1692 = vrcp.f32 %v1011_v9  ;;  %v1028_v23 = vrot.slane %v2218_v17, %v2264_v0  ;;  %v1032_v25 = vrot.slane %v2224_v14, %v2264_v0  ;;  %v1044_v3 = vrot.slane %v2221_v21, %v2264_v0 }
 0x23a   : > { %1694 = vrcp.f32 %v1012_v16  ;;  %v983_v22 = vsub.f32 %v911_v18, %v975_v19  ;;  %v984_v24 = vsub.f32 %v912_v20, %v976_v60  ;;  %v1040_v21 = vrot.slane %v2247_v42, %v2264_v0 }
 0x23b   : > { %v1065_v47 = vsub.f32 %v1028_v23, %v2152_v56  ;;  %v1066_v14 = vsub.f32 %v1032_v25, %v2145_v51  ;;  %v1036_v56 = vrot.slane %v2243_v49, %v2264_v0  ;;  %v1069_v40 = vsub.f32 %v1044_v3, %v2190_v55 }
 0x23c   : > { %vm991_vm8 = vcmp.eq.f32.partialorder %v983_v22, 0.0  ;;  %vm992_vm9 = vcmp.eq.f32.partialorder %v984_v24, 0.0  ;;  %v1048_v49 = vrot.slane %v2230_v26, %v2264_v0  ;;  %v1068_v55 = vsub.f32 %v1040_v21, %v2159_v1 }
 0x23d   : > { %v1510_v27 = vsel %vm991_vm8, 1.0, %v1880_v8  ;;  %v1511_v31 = vsel %vm992_vm9, 1.0, %v1880_v8  ;;  %v1067_v53 = vsub.f32 %v1036_v56, %v2166_v11  ;;  %v1052_v11 = vrot.slane %v2261_v44, %v2264_v0 }
 0x23e   : > { %v1015_v30 = vadd.f32 %v1510_v27, %v983_v22  ;;  %v1016_v17 = vadd.f32 %v1511_v31, %v984_v24  ;;  %v1070_v4 = vsub.f32 %v1048_v49, %v2176_v43  ;;  %v1056_v26 = vrot.slane %v2269_v15, %v2264_v0 }
 0x23f   : > { %v1685_v28 = vpop.eup %1684  ;;  %v1071_v9 = vsub.f32 %v1052_v11, %v2207_v29 }
 0x240   : > { %v1076_v32 = vrot.slane %v1685_v28, %v2264_v0  ;;  %v1687_v34 = vpop.eup %1686  ;;  %1696 = vrcp.f32 %v1015_v30  ;;  %v1072_v13 = vsub.f32 %v1056_v26, %v2199_v10 }
 0x241   : > { %v1689_v35 = vpop.eup %1688  ;;  %v1080_v45 = vrot.slane %v1687_v34, %v2264_v0  ;;  %1698 = vrcp.f32 %v1016_v17 }
 0x242   : > { %v1105_v36 = vmul.f32 %v1076_v32, %v1065_v47  ;;  %v1092_v37 = vrot.slane %v1689_v35, %v2264_v0 }
 0x243   : > { %v1106_v38 = vmul.f32 %v1080_v45, %v1066_v14 }
 0x244   : > { %v1113_v8 = vmul.f32 %v1105_v36, %v1105_v36  ;;  %v1691_v48 = vpop.eup %1690  ;;  %v1109_v51 = vmul.f32 %v1092_v37, %v1069_v40  ;;  %v1186_v40 = vand.u32 127, %v796_v12 }
 0x245   : > { %v1114_v46 = vmul.f32 %v1106_v38, %v1106_v38  ;;  %v1096_v61 = vrot.slane %v1691_v48, %v2264_v0 }
 0x246   : > { %v1121_v41 = vsel %vm356_vm0, %v1113_v8, 0.0  ;;  %v1693_v50 = vpop.eup %1692  ;;  %v1117_v58 = vmul.f32 %v1109_v51, %v1109_v51 }
 0x247   : > { %1122 = vadd.xlane.f32.xlu0 %v1121_v41  ;;  %v1695_v52 = vpop.eup %1694  ;;  %v1084_v54 = vrot.slane %v1693_v50, %v2264_v0  ;;  %v1124_v39 = vsel %vm356_vm0, %v1114_v46, 0.0  ;;  %v1110_v7 = vmul.f32 %v1096_v61, %v1070_v4  ;;  %v2319_v50 = vsub.s32 %v1186_v40, %v2174_v33 }
 0x248   : > { %v1088_v57 = vrot.slane %v1695_v52, %v2264_v0  ;;  %v1133_v6 = vsel %vm356_vm0, %v1117_v58, 0.0 }
 0x249   : > { %v1107_v42 = vmul.f32 %v1084_v54, %v1067_v53  ;;  %v1118_v18 = vmul.f32 %v1110_v7, %v1110_v7 }
 0x24a   : > { %v1108_v62 = vmul.f32 %v1088_v57, %v1068_v55 }
 0x24b   : > { %1125 = vadd.xlane.f32.xlu0 %v1124_v39  ;;  %v1115_v63 = vmul.f32 %v1107_v42, %v1107_v42  ;;  %v1136_v22 = vsel %vm356_vm0, %v1118_v18, 0.0 }
 0x24c   : > { %v1116_v2 = vmul.f32 %v1108_v62, %v1108_v62 }
 0x24d   : > { %v1697_v1 = vpop.eup %1696  ;;  %v1127_v5 = vsel %vm356_vm0, %v1115_v63, 0.0 }
 0x24e   : > { %v1699_v59 = vpop.eup %1698  ;;  %1128 = vadd.xlane.f32.xlu1 %v1127_v5  ;;  %v1100_v44 = vrot.slane %v1697_v1, %v2264_v0  ;;  %v1130_v15 = vsel %vm356_vm0, %v1116_v2, 0.0 }
 0x24f   : > { %1134 = vadd.xlane.f32.xlu0 %v1133_v6  ;;  %v1104_v43 = vrot.slane %v1699_v59, %v2264_v0 }
 0x250   : > { %v1111_v16 = vmul.f32 %v1100_v44, %v1071_v9 }
 0x251   : > { %v1112_v19 = vmul.f32 %v1104_v43, %v1072_v13 }
 0x252   : > { %1131 = vadd.xlane.f32.xlu1 %v1130_v15  ;;  %v1119_v20 = vmul.f32 %v1111_v16, %v1111_v16 }
 0x253   : > { %v1120_v23 = vmul.f32 %v1112_v19, %v1112_v19 }
 0x254   : > { %v1139_v60 = vsel %vm356_vm0, %v1119_v20, 0.0 }
 0x255   : > { %1140 = vadd.xlane.f32.xlu0 %v1139_v60  ;;  %v1142_v29 = vsel %vm356_vm0, %v1120_v23, 0.0  ;;  %vm1231_vm0 = vcmask 1047559   ;;  %v1883_v60 = vmov 0   ;;  %v1246_v23 = vsub.s32 1, %v2174_v33 }
 0x256   : > { %1137 = vadd.xlane.f32.xlu1 %v1136_v22  ;;  %1683 = vset.pattern.permute.xlu0 %v1883_v60 }
 0x257   : > { %1682 = vset.pattern.permute.xlu1 %v1883_v60 }
 0x25a   : > { %1143 = vadd.xlane.f32.xlu1 %v1142_v29  ;;  %v1250_v29 = vsub.s32 2, %v2174_v33 }
 0x2d0   : > { %v1123_v10 = vpop.xlane.xlu0 %1122 }
 0x2d1   : > { %v1145_v24 = vmul.f32 -2.0, %v1123_v10 }
 0x2d3   : > { %v1153_v25 = vmul.f32 1.442695, %v1145_v24 }
 0x2d4   : > { %v1126_v27 = vpop.xlane.xlu0 %1125 }
 0x2d5   : > { %v1146_v28 = vmul.f32 -2.0, %v1126_v27  ;;  %1700 = vpow2.f32 %v1153_v25 }
 0x2d7   : > { %v1155_v30 = vmul.f32 1.442695, %v1146_v28  ;;  %v1129_v31 = vpop.xlane.xlu1 %1128 }
 0x2d8   : > { %v1135_v47 = vpop.xlane.xlu0 %1134  ;;  %v1147_v32 = vmul.f32 -2.0, %v1129_v31  ;;  %v1254_v31 = vsub.s32 3, %v2174_v33 }
 0x2d9   : > { %1702 = vpow2.f32 %v1155_v30  ;;  %v1149_v3 = vmul.f32 -2.0, %v1135_v47 }
 0x2da   : > { %v1157_v17 = vmul.f32 1.442695, %v1147_v32 }
 0x2db   : > { %v1161_v34 = vmul.f32 1.442695, %v1149_v3  ;;  %v1132_v35 = vpop.xlane.xlu1 %1131  ;;  %v1258_v3 = vsub.s32 4, %v2174_v33 }
 0x2dc   : > { %1704 = vpow2.f32 %v1157_v17  ;;  %v1148_v36 = vmul.f32 -2.0, %v1132_v35  ;;  %v1262_v35 = vsub.s32 5, %v2174_v33 }
 0x2dd   : > { %1706 = vpow2.f32 %v1161_v34 }
 0x2de   : > { %v1159_v14 = vmul.f32 1.442695, %v1148_v36  ;;  %v1141_v45 = vpop.xlane.xlu0 %1140 }
 0x2df   : > { %v1138_v37 = vpop.xlane.xlu1 %1137  ;;  %v1151_v8 = vmul.f32 -2.0, %v1141_v45 }
 0x2e0   : > { %1708 = vpow2.f32 %v1159_v14  ;;  %v1150_v56 = vmul.f32 -2.0, %v1138_v37 }
 0x2e1   : > { %v1165_v38 = vmul.f32 1.442695, %v1151_v8  ;;  %v1270_v8 = vsub.s32 7, %v2174_v33 }
 0x2e2   : > { %v1163_v21 = vmul.f32 1.442695, %v1150_v56  ;;  %v1701_v48 = vpop.eup %1700 }
 0x2e3   : > { %1710 = vpow2.f32 %v1165_v38  ;;  %v1144_v41 = vpop.xlane.xlu1 %1143  ;;  %v1169_v52 = vmul.f32 0.5641896, %v1701_v48 }
 0x2e4   : > { %1712 = vpow2.f32 %v1163_v21  ;;  %v1152_v46 = vmul.f32 -2.0, %v1144_v41 }
 0x2e5   : > { %v1190_v12 = vrot.slane %v1169_v52, %v2319_v50 }
 0x2e6   : > { %v1703_v51 = vpop.eup %1702  ;;  %v1167_v54 = vmul.f32 1.442695, %v1152_v46 }
 0x2e7   : > { %v1170_v53 = vmul.f32 0.5641896, %v1703_v51 }
 0x2e8   : > { %1714 = vpow2.f32 %v1167_v54 }
 0x2e9   : > { %v1194_v49 = vrot.slane %v1170_v53, %v2319_v50  ;;  %v1705_v55 = vpop.eup %1704 }
 0x2ea   : > { %v1707_v57 = vpop.eup %1706  ;;  %v1171_v42 = vmul.f32 0.5641896, %v1705_v55 }
 0x2eb   : > { %v1173_v39 = vmul.f32 0.5641896, %v1707_v57  ;;  %v1220_v58 = vsel %vm1219_vm10, %v1194_v49, %v1190_v12 }
 0x2ec   : > { %v1198_v62 = vrot.slane %v1171_v42, %v2319_v50 }
 0x2ed   : > { %v1709_v61 = vpop.eup %1708  ;;  %v1206_v63 = vrot.slane %v1173_v39, %v2319_v50 }
 0x2ee   : > { %v1172_v11 = vmul.f32 0.5641896, %v1709_v61  ;;  %v1222_v4 = vsel %vm1221_vm11, %v1198_v62, %v1220_v58 }
 0x2f0   : > { %v1711_v26 = vpop.eup %1710  ;;  %v1202_v1 = vrot.slane %v1172_v11, %v2319_v50 }
 0x2f1   : > { %v1713_v5 = vpop.eup %1712  ;;  %v1175_v2 = vmul.f32 0.5641896, %v1711_v26 }
 0x2f2   : > { %v1174_v6 = vmul.f32 0.5641896, %v1713_v5  ;;  %v1224_v7 = vsel %vm1223_vm12, %v1202_v1, %v1222_v4 }
 0x2f3   : > { %v1214_v59 = vrot.slane %v1175_v2, %v2319_v50  ;;  %v1226_v9 = vsel %vm1225_vm13, %v1206_v63, %v1224_v7 }
 0x2f4   : > { %v1210_v44 = vrot.slane %v1174_v6, %v2319_v50 }
 0x2f5   : > { %v1715_v13 = vpop.eup %1714 }
 0x2f6   : > { %v1176_v43 = vmul.f32 0.5641896, %v1715_v13  ;;  %v1228_v16 = vsel %vm1227_vm14, %v1210_v44, %v1226_v9 }
 0x2f7   : > { %v1230_v15 = vsel %vm1229_vm15, %v1214_v59, %v1228_v16 }
 0x2f8   : > { %v1218_v18 = vrot.slane %v1176_v43, %v2319_v50 }
 0x2fa   : > { %v1232_v19 = vsel %vm1231_vm0, %v1218_v18, %v1230_v15 }
 0x2fb   : > { %v1235_v20 = vsel %vm1234_vm1, %v1232_v19, 0.0 }
 0x2fc   : > { %1236 = vadd.xlane.f32.xlu0 %v1235_v20 }
 0x385   : > { %v1237_v22 = vpop.xlane.xlu0 %1236 }
 0x386   : > { %1716 = vrcp.f32 %v1237_v22 }
 0x393   : > { %v1717_v10 = vpop.eup %1716 }
 0x394   : > { %v1247_v24 = vrot.slane %v1717_v10, %v1246_v23  ;;  %v1243_v25 = vrot.slane %v1717_v10, %v2264_v0  ;;  %v1251_v30 = vrot.slane %v1717_v10, %v1250_v29  ;;  %v1255_v32 = vrot.slane %v1717_v10, %v1254_v31 }
 0x395   : > { %v1259_v34 = vrot.slane %v1717_v10, %v1258_v3  ;;  %v1263_v14 = vrot.slane %v1717_v10, %v1262_v35  ;;  %v1266_v0 = vsub.s32 6, %v2174_v33  ;;  %v1271_v38 = vrot.slane %v1717_v10, %v1270_v8 }
 0x396   : > { %v1281_v27 = vmul.f32 %v1247_v24, %v1170_v53  ;;  %v1280_v28 = vmul.f32 %v1243_v25, %v1169_v52  ;;  %v1282_v47 = vmul.f32 %v1251_v30, %v1171_v42  ;;  %v1283_v17 = vmul.f32 %v1255_v32, %v1172_v11 }
 0x397   : > { %v1284_v36 = vmul.f32 %v1259_v34, %v1173_v39  ;;  %v1285_v45 = vmul.f32 %v1263_v14, %v1174_v6  ;;  %v1267_v37 = vrot.slane %v1717_v10, %v1266_v0  ;;  %v1287_v40 = vmul.f32 %v1271_v38, %v1176_v43 }
 0x398   : > { %1300 = vperm.xlu0 %1683, %v1281_v27   ;;  %1297 = vperm.xlu1 %1682, %v1280_v28  }
 0x399   : > { %v1286_v56 = vmul.f32 %v1267_v37, %v1175_v2 }
 0x39c   : > { %1303 = vperm.xlu1 %1682, %v1282_v47  }
 0x3a0   : > { %1306 = vperm.xlu1 %1682, %v1283_v17  }
 0x3a4   : > { %1309 = vperm.xlu1 %1682, %v1284_v36  }
 0x3a8   : > { %1312 = vperm.xlu1 %1682, %v1285_v45  }
 0x3ac   : > { %1315 = vperm.xlu1 %1682, %v1286_v56  }
 0x3b0   : > { %1318 = vperm.xlu1 %1682, %v1287_v40  }
 0x413   : > { %v1298_v21 = vpop.permute.xlu1 %1297  ;;  %v1301_v51 = vpop.permute.xlu0 %1300 }
 0x414   : > { %v1327_v53 = vrot.slane %v1301_v51, %v2319_v50  ;;  %v1323_v54 = vrot.slane %v1298_v21, %v2319_v50 }
 0x416   : > { %v1352_v12 = vsel %vm1219_vm10, %v1327_v53, %v1323_v54 }
 0x417   : > { %v1304_v48 = vpop.permute.xlu1 %1303 }
 0x418   : > { %v1331_v33 = vrot.slane %v1304_v48, %v2319_v50 }
 0x41a   : > { %v1353_v39 = vsel %vm1221_vm11, %v1331_v33, %v1352_v12 }
 0x41b   : > { %v1307_v41 = vpop.permute.xlu1 %1306 }
 0x41c   : > { %v1335_v49 = vrot.slane %v1307_v41, %v2319_v50 }
 0x41e   : > { %v1354_v61 = vsel %vm1223_vm12, %v1335_v49, %v1353_v39 }
 0x41f   : > { %v1310_v46 = vpop.permute.xlu1 %1309 }
 0x420   : > { %v1339_v55 = vrot.slane %v1310_v46, %v2319_v50 }
 0x422   : > { %v1355_v62 = vsel %vm1225_vm13, %v1339_v55, %v1354_v61 }
 0x423   : > { %v1313_v52 = vpop.permute.xlu1 %1312 }
 0x424   : > { %v1343_v42 = vrot.slane %v1313_v52, %v2319_v50 }
 0x426   : > { %v1356_v63 = vsel %vm1227_vm14, %v1343_v42, %v1355_v62 }
 0x427   : > { %v1316_v57 = vpop.permute.xlu1 %1315 }
 0x428   : > { %v1347_v58 = vrot.slane %v1316_v57, %v2319_v50 }
 0x42a   : > { %v1357_v26 = vsel %vm1229_vm15, %v1347_v58, %v1356_v63 }
 0x42b   : > { %v1319_v11 = vpop.permute.xlu1 %1318 }
 0x42c   : > { %v1351_v4 = vrot.slane %v1319_v11, %v2319_v50 }
 0x42e   : > { %v1358_v1 = vsel %vm1231_vm0, %v1351_v4, %v1357_v26 }
 0x42f   : > { %1360 = vst.msk [vmem:[%s336_s12] sm:$0xff] %vm1234_vm1, %v1358_v1 }
 0x430 PF: > { %s2401_s25 = smov %s2000_s21  ;;  %p20_p3 = scmp.ge.s32.totalorder %s1987_s17, 4  }
 0x431   : > { %s2402_s21 = smov %s1864_s22  ;;  %s2403_s22 = smov %s1868_s23 }
 0x432   : > { %s2404_s23 = smov %s2401_s25  ;;  %s2405_s24 = smov %s1987_s17 }
 0x433   :  { %22 = sbr.rel (!%p20_p3) target bundleno = 8 (0x8), region = 105 }
 0x438   :  { %1380 = vsyncpa [#allocation3], 1 }
 0x439   :  { %1382 = vsyncpa [#allocation3 + $0x1], 1 }
 0x43a   :  { %1383 = vsyncpa [#allocation5], 1 }
 0x43b   :  { %1385 = vsyncpa [#allocation5 + $0x1], 1 }
 0x43c   :  { %1386 = vsyncpa [#allocation8], 1 }

</bundles_post_ra>
